<compile_context>
chip_gen: v7x
topology: tpu7x:2x2x1
jax: 0.10.0
libtpu: 0.0.40
codegen_flags: <defaults>
</compile_context>

<pallas_src>
import math
import functools

import jax
import jax.numpy as jnp
from jax.experimental import pallas as pl
from jax.experimental.pallas import tpu as pltpu


def _attn_kernel_dropout(x_ref, w_ref, b_ref, u_ref, o_ref, *, dropout_p):
    Bblk, S, D = x_ref.shape
    # Fused projection: one (Bblk*S, D) x (D, 2D) MXU matmul, f32 accumulate.
    x2 = x_ref[...].reshape(Bblk * S, D)
    proj = jnp.dot(x2, w_ref[...], preferred_element_type=jnp.float32) + b_ref[...]
    proj = proj.reshape(Bblk, S, 2 * D)
    qk = proj[:, :, :D]            # scale_factor already folded into W/b
    v = proj[:, :, D:]

    # attention scores + numerically stable softmax (un-normalized)
    s = jnp.einsum('bqd,bkd->bqk', qk, v, preferred_element_type=jnp.float32)
    s = s - jnp.max(s, axis=-1, keepdims=True)
    e = jnp.exp(s)
    denom = jnp.sum(e, axis=-1, keepdims=True)

    # dropout (drop with prob p, rescale survivors); fold the softmax
    # normalization and the 1/(1-p) rescale into one multiply.
    keep = u_ref[...] >= jnp.float32(dropout_p)
    inv = (1.0 / (1.0 - dropout_p)) / denom
    p = jnp.where(keep, e, 0.0) * inv

    out = jnp.einsum('bqk,bkd->bqd', p, v, preferred_element_type=jnp.float32)
    o_ref[...] = out.astype(o_ref.dtype)


def _attn_kernel_eval(x_ref, w_ref, b_ref, o_ref):
    Bblk, S, D = x_ref.shape
    x2 = x_ref[...].reshape(Bblk * S, D)
    proj = jnp.dot(x2, w_ref[...], preferred_element_type=jnp.float32) + b_ref[...]
    proj = proj.reshape(Bblk, S, 2 * D)
    qk = proj[:, :, :D]
    v = proj[:, :, D:]
    s = jnp.einsum('bqd,bkd->bqk', qk, v, preferred_element_type=jnp.float32)
    s = s - jnp.max(s, axis=-1, keepdims=True)
    e = jnp.exp(s)
    p = e / jnp.sum(e, axis=-1, keepdims=True)
    out = jnp.einsum('bqk,bkd->bqd', p, v, preferred_element_type=jnp.float32)
    o_ref[...] = out.astype(o_ref.dtype)


def attention_forward(x, w_qk, b_qk, w_v, b_v, *,
                      scale_factor=math.sqrt(0.5), dropout_p=0.5,
                      training=True, rng_key=None, block_b=None):
    """x: (B, S, D) f32; weights (D, D) in PyTorch (out, in) layout; biases (D,)."""
    B, S, D = x.shape
    if block_b is None:
        block_b = B                  # all batch elements in one grid step
    assert B % block_b == 0
    grid = (B // block_b,)

    # One-time wrapper prep: pre-transpose to (in, out), fold scale_factor
    # into the qk projection, fuse both projections into one (D, 2D) weight.
    w_fused = jnp.concatenate([w_qk.T * scale_factor, w_v.T], axis=1)       # (D, 2D)
    b_fused = jnp.concatenate([b_qk * scale_factor, b_v]).reshape(1, 2 * D)  # (1, 2D)

    x_spec = pl.BlockSpec((block_b, S, D), lambda i: (i, 0, 0))
    w_spec = pl.BlockSpec((D, 2 * D), lambda i: (0, 0))
    b_spec = pl.BlockSpec((1, 2 * D), lambda i: (0, 0))
    o_spec = pl.BlockSpec((block_b, S, D), lambda i: (i, 0, 0))
    out_shape = jax.ShapeDtypeStruct((B, S, D), x.dtype)
    cparams = pltpu.CompilerParams(dimension_semantics=("parallel",))

    if training and dropout_p > 0.0:
        if rng_key is None:
            rng_key = jax.random.PRNGKey(0)
        u = jax.random.uniform(rng_key, (B, S, S), dtype=jnp.float32)
        u_spec = pl.BlockSpec((block_b, S, S), lambda i: (i, 0, 0))
        kernel = functools.partial(_attn_kernel_dropout, dropout_p=float(dropout_p))
        return pl.pallas_call(
            kernel,
            out_shape=out_shape,
            grid=grid,
            in_specs=[x_spec, w_spec, b_spec, u_spec],
            out_specs=o_spec,
            compiler_params=cparams,
        )(x, w_fused, b_fused, u)
    else:
        return pl.pallas_call(
            _attn_kernel_eval,
            out_shape=out_shape,
            grid=grid,
            in_specs=[x_spec, w_spec, b_spec],
            out_specs=o_spec,
            compiler_params=cparams,
        )(x, w_fused, b_fused)


def _reference(x, w_qk, b_qk, w_v, b_v, scale_factor):
    qk = x @ w_qk.T + b_qk
    v = x @ w_v.T + b_v
    attn = jnp.einsum('bqd,bkd->bqk', qk, v) * scale_factor
    p = jax.nn.softmax(attn, axis=-1)
    return jnp.einsum('bqk,bkd->bqd', p, v)


if __name__ == "__main__":
    # Small shapes consistent with the module's forward: (batch, seq, input_dim)
    B, S, D = 2, 8, 32

    key = jax.random.PRNGKey(0)
    kx, kw1, kb1, kw2, kb2, kdrop = jax.random.split(key, 6)

    x = jax.random.normal(kx, (B, S, D), dtype=jnp.float32)

    # Deterministic Linear param init (uniform +-1/sqrt(fan_in), like nn.Linear)
    bound = 1.0 / math.sqrt(D)
    w_qk = jax.random.uniform(kw1, (D, D), jnp.float32, -bound, bound)
    b_qk = jax.random.uniform(kb1, (D,), jnp.float32, -bound, bound)
    w_v = jax.random.uniform(kw2, (D, D), jnp.float32, -bound, bound)
    b_v = jax.random.uniform(kb2, (D,), jnp.float32, -bound, bound)

    scale = math.sqrt(0.5)

    # Correctness sanity check (dropout disabled so it is deterministic).
    out_eval = attention_forward(x, w_qk, b_qk, w_v, b_v,
                                 scale_factor=scale, dropout_p=0.5,
                                 training=False)
    ref = _reference(x, w_qk, b_qk, w_v, b_v, scale)
    jax.block_until_ready(out_eval)
    assert out_eval.shape == (B, S, D)
    assert jnp.allclose(out_eval, ref, atol=1e-2, rtol=1e-2)

    # Training-mode forward (matches the PyTorch module's default semantics).
    out = attention_forward(x, w_qk, b_qk, w_v, b_v,
                            scale_factor=scale, dropout_p=0.5,
                            training=True, rng_key=kdrop)
    jax.block_until_ready(out)
    assert out.shape == (B, S, D)
    print("KERNEL_OK")
</pallas_src>

<mosaic_0001>
module attributes {stable_mosaic.version = 11 : i64} {
  func.func @_attn_kernel_eval(%arg0: i32, %arg1: memref<2x8x32xf32, #tpu.memory_space<vmem>>, %arg2: memref<32x64xf32, #tpu.memory_space<vmem>>, %arg3: memref<1x64xf32, #tpu.memory_space<vmem>>, %arg4: memref<2x8x32xf32, #tpu.memory_space<vmem>>) attributes {dimension_semantics = [#tpu.dimension_semantics<parallel>], iteration_bounds = array<i64: 1>, scalar_prefetch = 0 : i64, scratch_operands = 0 : i64, tpu.core_type = #tpu.core_type<tc>, window_params = [{transform_indices = @transform_0, window_bounds = array<i64: 2, 8, 32>}, {pipeline_mode = #tpu.pipeline_mode<synchronous>, transform_indices = @transform_1, window_bounds = array<i64: 32, 64>}, {pipeline_mode = #tpu.pipeline_mode<synchronous>, transform_indices = @transform_2, window_bounds = array<i64: 1, 64>}, {transform_indices = @transform_3, window_bounds = array<i64: 2, 8, 32>}]} {
    %c0 = arith.constant 0 : index
    %c0_0 = arith.constant 0 : index
    %c0_1 = arith.constant 0 : index
    %0 = vector.load %arg1[%c0, %c0_0, %c0_1] : memref<2x8x32xf32, #tpu.memory_space<vmem>>, vector<2x8x32xf32>
    %1 = vector.shape_cast %0 : vector<2x8x32xf32> to vector<16x32xf32>
    %c0_2 = arith.constant 0 : index
    %c0_3 = arith.constant 0 : index
    %2 = vector.load %arg2[%c0_2, %c0_3] : memref<32x64xf32, #tpu.memory_space<vmem>>, vector<32x64xf32>
    %cst = arith.constant dense<0.000000e+00> : vector<16x64xf32>
    %3 = tpu.matmul %1, %2, %cst {dimension_numbers = #tpu.dot_dimension_numbers<[1], [0], [0], [1], [0, 0, 1, 1], [], []>} : vector<16x32xf32>, vector<32x64xf32>, vector<16x64xf32> -> vector<16x64xf32>
    %c0_4 = arith.constant 0 : index
    %c0_5 = arith.constant 0 : index
    %4 = vector.load %arg3[%c0_4, %c0_5] : memref<1x64xf32, #tpu.memory_space<vmem>>, vector<1x64xf32>
    %5 = vector.broadcast %4 : vector<1x64xf32> to vector<16x64xf32>
    %6 = arith.addf %3, %5 : vector<16x64xf32>
    %7 = vector.shape_cast %6 : vector<16x64xf32> to vector<2x8x64xf32>
    %8 = vector.extract_strided_slice %7 {offsets = [0, 0, 0], sizes = [2, 8, 32], strides = [1, 1, 1]} : vector<2x8x64xf32> to vector<2x8x32xf32>
    %9 = vector.extract_strided_slice %7 {offsets = [0, 0, 32], sizes = [2, 8, 32], strides = [1, 1, 1]} : vector<2x8x64xf32> to vector<2x8x32xf32>
    "tpu.trace_start"() <{level = 10 : i32, message = "bqd,bkd->bqk"}> : () -> ()
    %cst_6 = arith.constant dense<0.000000e+00> : vector<2x8x8xf32>
    %10 = tpu.matmul %8, %9, %cst_6 {dimension_numbers = #tpu.dot_dimension_numbers<[2], [2], [1], [1], [0, 0, 0, 1, 1, 1], [0], [0]>} : vector<2x8x32xf32>, vector<2x8x32xf32>, vector<2x8x8xf32> -> vector<2x8x8xf32>
    "tpu.trace_stop"() : () -> ()
    %cst_7 = arith.constant dense<0xFF800000> : vector<2x8xf32>
    %11 = vector.multi_reduction <maximumf>, %10, %cst_7 [2] : vector<2x8x8xf32> to vector<2x8xf32>
    %12 = vector.shape_cast %11 : vector<2x8xf32> to vector<2x8x1xf32>
    %13 = vector.broadcast %12 : vector<2x8x1xf32> to vector<2x8x8xf32>
    %14 = arith.subf %10, %13 : vector<2x8x8xf32>
    %15 = math.exp %14 : vector<2x8x8xf32>
    %cst_8 = arith.constant dense<0.000000e+00> : vector<2x8xf32>
    %16 = vector.multi_reduction <add>, %15, %cst_8 [2] : vector<2x8x8xf32> to vector<2x8xf32>
    %17 = vector.shape_cast %16 : vector<2x8xf32> to vector<2x8x1xf32>
    %18 = vector.broadcast %17 : vector<2x8x1xf32> to vector<2x8x8xf32>
    %19 = arith.divf %15, %18 : vector<2x8x8xf32>
    "tpu.trace_start"() <{level = 10 : i32, message = "bqk,bkd->bqd"}> : () -> ()
    %cst_9 = arith.constant dense<0.000000e+00> : vector<2x8x32xf32>
    %20 = tpu.matmul %19, %9, %cst_9 {dimension_numbers = #tpu.dot_dimension_numbers<[2], [1], [1], [2], [0, 0, 0, 1, 1, 2], [0], [0]>} : vector<2x8x8xf32>, vector<2x8x32xf32>, vector<2x8x32xf32> -> vector<2x8x32xf32>
    "tpu.trace_stop"() : () -> ()
    %c0_10 = arith.constant 0 : index
    %c0_11 = arith.constant 0 : index
    %c0_12 = arith.constant 0 : index
    %21 = vector.load %arg4[%c0_10, %c0_11, %c0_12] : memref<2x8x32xf32, #tpu.memory_space<vmem>>, vector<2x8x32xf32>
    tpu.vector_store %arg4[%c0_10, %c0_11, %c0_12], %20 {strides = array<i32>} : memref<2x8x32xf32, #tpu.memory_space<vmem>>, vector<2x8x32xf32>,
    return
  }
  func.func @transform_0(%arg0: i32) -> (i32, i32, i32) {
    %c0_i32 = arith.constant 0 : i32
    %c0_i32_0 = arith.constant 0 : i32
    %c0_i32_1 = arith.constant 0 : i32
    return %arg0, %c0_i32, %c0_i32_0 : i32, i32, i32
  }
  func.func @transform_1(%arg0: i32) -> (i32, i32) {
    %c0_i32 = arith.constant 0 : i32
    %c0_i32_0 = arith.constant 0 : i32
    %c0_i32_1 = arith.constant 0 : i32
    return %c0_i32, %c0_i32_0 : i32, i32
  }
  func.func @transform_2(%arg0: i32) -> (i32, i32) {
    %c0_i32 = arith.constant 0 : i32
    %c0_i32_0 = arith.constant 0 : i32
    %c0_i32_1 = arith.constant 0 : i32
    return %c0_i32, %c0_i32_0 : i32, i32
  }
  func.func @transform_3(%arg0: i32) -> (i32, i32, i32) {
    %c0_i32 = arith.constant 0 : i32
    %c0_i32_0 = arith.constant 0 : i32
    %c0_i32_1 = arith.constant 0 : i32
    return %arg0, %c0_i32, %c0_i32_0 : i32, i32, i32
  }
}

</mosaic_0001>

<bundles_post_ra>
// kernel: tpu_custom_call.1
= control target key start
LH: loop header
LB: loop body
LE: loop exit
PB: predicated region body
PF: predicated region fallthrough
CT: control target
= control target key end

     0   :  { %8 = vsyncpa [#allocation3], 0  ;;  %s727_s0 = inlined_call_operand.hbm [shape: f32[2,8,32], index: 0, kind: input, shape index: {}]   ;;  %s728_s1 = inlined_call_operand.hbm [shape: f32[32,64], index: 1, kind: input, shape index: {}]   ;;  %s729_s2 = inlined_call_operand.vmem [shape: f32[1,64], index: 2, kind: input, shape index: {}]   ;;  %s730_s3 = inlined_call_operand.hbm [shape: f32[2,8,32], index: 3, kind: output, shape index: {}]  }
   0x1   :  { %9 = vsyncpa [#allocation6], 0 }
   0x2   :  { %10 = vsyncpa [#allocation4], 0  ;;  %s633_s12 = smov [#allocation2]   ;;  %s561_s16 = scalar_lea.hbm %s727_s0, 256 }
   0x3   :  { %s16_s13 = sshll.u32 %s633_s12, 4  ;;  %p562_p0 = scmp.ne.s32.totalorder %s727_s0, %s561_s16  ;;  %s17_s13 = int_to_ptr.vmem [resolvable:$true] %s16_s13 }
   0x4   :  { %p565_p1 = scmp.lt.u32.totalorder %s561_s16, %s727_s0 }
   0x6   :  { %p567_p2 = pnand %p565_p1, %p562_p0 }
   0x8   :  { %570 = shalt.err (!%p567_p2)
}
   0x9   :  { %s571_s21 = scalar_lea.vmem %s17_s13, 256  ;;  %p576_p4 = scmp.lt.s32.totalorder %s17_s13, %s17_s13 }
   0xa   :  { %p572_p3 = scmp.ne.s32.totalorder %s17_s13, %s571_s21  ;;  %p577_p5 = scmp.lt.s32.totalorder %s571_s21, %s571_s21 }
   0xc   :  { %p578_p6 = por %p577_p5, %p576_p4 }
   0xe   :  { %p579_p7 = pnand %p578_p6, %p572_p3 }
  0x10   :  { %582 = shalt.err (!%p579_p7)
}
  0x11   :  { %s634_s22 = smov 128   ;;  %s635_s23 = smov 8  }
  0x12   :  { %22 = dma.hbm_to_vmem [thread:$0]  %s727_s0, 256, %s17_s13, [#allocation3], %s634_s22, %s634_s22, %s635_s23  }
  0x13   :  { %s636_s26 = smov [#allocation5]   ;;  %s583_s30 = scalar_lea.hbm %s728_s1, 512 }
  0x14   :  { %s28_s27 = sshll.u32 %s636_s26, 4  ;;  %p584_p8 = scmp.ne.s32.totalorder %s728_s1, %s583_s30  ;;  %s29_s27 = int_to_ptr.vmem [resolvable:$true] %s28_s27 }
  0x15   :  { %p587_p9 = scmp.lt.u32.totalorder %s583_s30, %s728_s1 }
  0x17   :  { %p589_p10 = pnand %p587_p9, %p584_p8 }
  0x19   :  { %592 = shalt.err (!%p589_p10)
}
  0x1a   :  { %s593_s8 = scalar_lea.vmem %s29_s27, 512  ;;  %p598_p12 = scmp.lt.s32.totalorder %s29_s27, %s29_s27 }
  0x1b   :  { %p594_p11 = scmp.ne.s32.totalorder %s29_s27, %s593_s8  ;;  %p599_p13 = scmp.lt.s32.totalorder %s593_s8, %s593_s8 }
  0x1d   :  { %p600_p0 = por %p599_p13, %p598_p12 }
  0x1f   :  { %p601_p1 = pnand %p600_p0, %p594_p11 }
  0x21   :  { %604 = shalt.err (!%p601_p1)
}
  0x22   :  { %34 = dma.hbm_to_vmem [thread:$0]  %s728_s1, 512, %s29_s27, [#allocation6], %s634_s22, %s634_s22, %s635_s23  }
  0x23   :  { %627 = dma.done.wait [#allocation3], 256  }
  0x24   :  { %628 = vsyncadd [#allocation3], 4294967040 }
  0x25   :  { %629 = dma.done.wait [#allocation6], 512  }
  0x26   :  { %630 = vsyncadd [#allocation6], 4294966784  ;;  %vm56_vm0 = vcmask 261120   ;;  %v45_v0 = vld [vmem:[#allocation5] sm:$0xff]  ;;  %v46_v1 = vld [vmem:[#allocation5 + $0x8] sm:$0xff]  ;;  %v637_v8 = vmov 0.0  }
  0x27   :  { %v47_v2 = vld [vmem:[#allocation5 + $0x10] sm:$0xff]  ;;  %v537_v3 = vpack.c.bf16 %v46_v1, %v45_v0  ;;  %v48_v4 = vld [vmem:[#allocation5 + $0x18] sm:$0xff]  ;;  %517 = vmatprep.subr.mxu1 %v637_v8  ;;  %vm638_vm1 = vmmov 0   ;;  %s639_s11 = smov 96   ;;  %vm292_vm2 = vcmask 64512  }
  0x28   :  { %v43_v5 = vld [vmem:[#allocation2] sm:$0xff]  ;;  %v541_v6 = vpack.c.bf16 %v48_v4, %v47_v2  ;;  %v44_v7 = vld [vmem:[#allocation2 + $0x8] sm:$0xff]  ;;  %519 = vmatprep.mubr.msk.f32.mxu1 %vm638_vm1, %v637_v8 }
  0x29   :  { %514 = vmatprep.mubr.msk.f32.mxu0 %vm56_vm0, %v43_v5  ;;  %538 = vmatprep.subr.bf16.mxu0 %v537_v3  ;;  %v483_v9 = vld [vmem:[%s729_s2] ss:$0 sm:$0xff]  ;;  %s640_s2 = smov [#allocation7]  }
  0x2a   :  { %540 = vmatpush3.bf16.msra.mxu0 %v537_v3  ;;  %s470_s12 = sshll.u32 %s640_s2, 4  ;;  %s471_s12 = int_to_ptr.vmem [resolvable:$true] %s470_s12 }
  0x2b   :  { %542 = vmatprep.subr.bf16.mxu0 %v541_v6  ;;  %s605_s13 = scalar_lea.vmem %s471_s12, 256  ;;  %p610_p3 = scmp.lt.s32.totalorder %s471_s12, %s471_s12 }
  0x2c   :  { %p606_p2 = scmp.ne.s32.totalorder %s471_s12, %s605_s13  ;;  %p611_p4 = scmp.lt.s32.totalorder %s605_s13, %s605_s13 }
  0x2e   :  { %544 = vmatpush3.bf16.msra.mxu0 %v541_v6  ;;  %p612_p5 = por %p611_p4, %p610_p3 }
  0x2f   :  { %527 = vmatprep.subr.mxu0 %v637_v8 }
  0x30   :  { %p613_p6 = pnand %p612_p5, %p606_p2 }
  0x31   :  { %515 = vmatmul.mubr.msk.f32.vlgmr.msra.gmra.mrb[0].mxu0 %vm56_vm0, %v44_v7 }
  0x32   :  { %529 = vmatprep.mubr.msk.f32.mxu0 %vm638_vm1, %v637_v8 }
 0x104   :  { %v516_v10 = vpop.f32.mrb[0].mxu0 }
 0x105   :  { %v129_v11 = vpop.f32.mrb[1].mxu0  ;;  %v135_v13 = vadd.f32 %v516_v10, %v483_v9 }
 0x106   :  { %v130_v12 = vadd.f32 %v483_v9, %v129_v11 }
 0x108   :  { %139 = vrot.lane.b32.xlu0 %v130_v12, %s639_s11 }
 0x10c   :  { %216 = vrot.lane.b32.xlu0 %v135_v13, %s639_s11 }
 0x17a   :  { %v140_v14 = vpop.permute.xlu0 %139 }
 0x17b   :  { %518 = vmatpush3.xpose.msk.msra.mxu1 %vm56_vm0, %v140_v14  ;;  %528 = vmatpush3.msra.mxu0 %v140_v14 }
 0x17c   :  { %522 = vmatprep.subr.mxu1 %v637_v8 }
 0x17e   :  { %520 = vmatmul.mubr.msk.f32.vlgmr.msra.gmra.mrb[0].mxu1 %vm56_vm0, %v130_v12  ;;  %v217_v15 = vpop.permute.xlu0 %216 }
 0x17f   :  { %523 = vmatpush3.xpose.msk.msra.mxu1 %vm56_vm0, %v217_v15  ;;  %524 = vmatprep.mubr.msk.f32.mxu1 %vm638_vm1, %v637_v8 }
 0x180   :  { %532 = vmatprep.subr.mxu1 %v637_v8 }
 0x182   :  { %525 = vmatmul.mubr.msk.f32.vlgmr.msra.gmra.mrb[2].mxu1 %vm56_vm0, %v135_v13 }
 0x183   :  { %533 = vmatpush3.msra.mxu1 %v217_v15  ;;  %534 = vmatprep.mubr.msk.f32.mxu1 %vm638_vm1, %v637_v8 }
 0x251   :  { %v211_v16 = vpop.f32.mrb[0].mxu1 }
 0x252   :  { %v521_v17 = vpop.f32.mrb[1].mxu1  ;;  %v293_v18 = vsel %vm292_vm2, %v211_v16, -inf }
 0x253   :  { %294 = vmax.xlane.f32.xlu1 %v293_v18 }
 0x255   :  { %v288_v19 = vpop.f32.mrb[2].mxu1 }
 0x256   :  { %v526_v20 = vpop.f32.mrb[3].mxu1  ;;  %v296_v21 = vsel %vm292_vm2, %v288_v19, -inf }
 0x257   :  { %297 = vmax.xlane.f32.xlu1 %v296_v21 }
 0x2e0   :  { %v295_v22 = vpop.xlane.xlu1 %294 }
 0x2e1   :  { %v299_v23 = vsub.f32 %v211_v16, %v295_v22 }
 0x2e3   :  { %v301_v24 = vmul.f32 1.442695, %v299_v23 }
 0x2e4   :  { %v298_v25 = vpop.xlane.xlu1 %297 }
 0x2e5   :  { %553 = vpow2.f32 %v301_v24  ;;  %v300_v26 = vsub.f32 %v288_v19, %v298_v25 }
 0x2e7   :  { %v303_v27 = vmul.f32 1.442695, %v300_v26 }
 0x2e9   :  { %555 = vpow2.f32 %v303_v27 }
 0x2ef   :  { %v554_v28 = vpop.eup %553 }
 0x2f0   :  { %v305_v29 = vsel %vm292_vm2, %v554_v28, 0.0 }
 0x2f1   :  { %306 = vadd.xlane.f32.xlu0 %v305_v29 }
 0x2f3   :  { %v556_v30 = vpop.eup %555 }
 0x2f4   :  { %v308_v31 = vsel %vm292_vm2, %v556_v30, 0.0 }
 0x2f5   :  { %309 = vadd.xlane.f32.xlu1 %v308_v31 }
 0x37e   :  { %v307_v32 = vpop.xlane.xlu0 %306 }
 0x37f   :  { %557 = vrcp.f32 %v307_v32 }
 0x382   :  { %v310_v33 = vpop.xlane.xlu1 %309 }
 0x383   :  { %559 = vrcp.f32 %v310_v33 }
 0x389   :  { %v558_v34 = vpop.eup %557 }
 0x38a   :  { %v312_v35 = vmul.f32 %v558_v34, %v554_v28 }
 0x38c   :  { %530 = vmatmul.mubr.msk.f32.vlgmr.msra.gmra.mrb[2].mxu0 %vm292_vm2, %v312_v35 }
 0x38d   :  { %v560_v36 = vpop.eup %559 }
 0x38e   :  { %v314_v37 = vmul.f32 %v560_v36, %v556_v30 }
 0x390   :  { %535 = vmatmul.mubr.msk.f32.vlgmr.msra.gmra.mrb[4].mxu1 %vm292_vm2, %v314_v37 }
 0x45f   :  { %v385_v38 = vpop.f32.mrb[2].mxu0 }
 0x460   :  { %463 = vst.msk [vmem:[#allocation7] sm:$0xff] %vm56_vm0, %v385_v38  ;;  %v531_v39 = vpop.f32.mrb[3].mxu0 }
 0x463   :  { %v459_v40 = vpop.f32.mrb[4].mxu1 }
 0x464   :  { %464 = vst.msk [vmem:[#allocation7 + $0x8] sm:$0xff] %vm56_vm0, %v459_v40  ;;  %v536_v41 = vpop.f32.mrb[5].mxu1 }
 0x465   :  { %616 = shalt.err (!%p613_p6)
}
 0x466   :  { %s617_s16 = scalar_lea.hbm %s730_s3, 256 }
 0x467   :  { %p618_p7 = scmp.ne.s32.totalorder %s730_s3, %s617_s16  ;;  %p621_p8 = scmp.lt.u32.totalorder %s617_s16, %s730_s3 }
 0x469   :  { %p623_p9 = pnand %p621_p8, %p618_p7 }
 0x46b   :  { %626 = shalt.err (!%p623_p9)
}
 0x46c   :  { %476 = dma.vmem_to_hbm [thread:$0]  %s471_s12, 256, %s730_s3, [#allocation4], %s634_s22, %s634_s22, %s635_s23  }
 0x46d   :  { %631 = dma.done.wait [#allocation4], 256  }
 0x46e   :  { %632 = vsyncadd [#allocation4], 4294967040 }
 0x46f   :  { %480 = vsyncpa [#allocation3], 1 }
 0x470   :  { %481 = vsyncpa [#allocation6], 1 }
 0x471   :  { %482 = vsyncpa [#allocation4], 1 }

</bundles_post_ra>
